<compile_context>
chip_gen: v6e
topology: v6e:2x2x1
jax: 0.10.0
libtpu: 0.0.40
codegen_flags: <defaults>
</compile_context>

<pallas_src>
import jax
import jax.numpy as jnp
from jax.experimental import pallas as pl
from jax.experimental.pallas import tpu as pltpu  # noqa: F401  (TPU backend)

# ---- module constants (AttFlat(in_size=32, mid_size=32, out_size=2)) ----
B = 2          # batch
S = 8          # sequence length
IN = 32        # in_size
MID = 32       # mid_size
OUT = 2        # out_size (number of attention glimpses)
MERGE = 1024   # fixed by nn.Linear(in_size * out_size, 1024)


def attflat_kernel(x_ref, mask_ref, w1_ref, w2_ref, wm_ref, bias_ref, o_ref):
    x = x_ref[...]                                   # (B, S, IN) f32

    # --- unpack the small-parameter pack (one DMA instead of three) ---
    bm = bias_ref[0:1, :]                            # (1, MERGE)
    b1 = bias_ref[1:2, 0:MID]                        # (1, MID)
    b2 = bias_ref[1:2, MID:MID + OUT]                # (1, OUT)

    # --- MLP over the whole batch as one pair of 2-D MXU matmuls (dropout = identity) ---
    xf = x.reshape(B * S, IN)
    h = jnp.maximum(
        jnp.dot(xf, w1_ref[...], preferred_element_type=jnp.float32) + b1, 0.0)       # (B*S, MID)
    logits = jnp.dot(h, w2_ref[...], preferred_element_type=jnp.float32) + b2         # (B*S, OUT)

    # --- masked softmax over the sequence axis ---
    # additive -1e9 bias computed in-kernel from the raw float mask (1.0 = padding);
    # identical to masked_fill whenever a sample has >= 1 unmasked position.
    logits = logits.reshape(B, S, OUT) + mask_ref[...] * jnp.float32(-1e9)
    logits = logits - jnp.max(logits, axis=1, keepdims=True)
    e = jnp.exp(logits)
    att = e * pl.reciprocal(jnp.sum(e, axis=1, keepdims=True), approx=True)            # (B, S, OUT)

    # --- attention-flatten: glimpse-major concat of sum_s att[:, s, o] * x[:, s, :] ---
    # OUT is tiny and static -> unrolls to a couple of VPU mul+reduce ops.
    glimpses = [jnp.sum(att[:, :, o:o + 1] * x, axis=1) for o in range(OUT)]            # each (B, IN)
    flat = jnp.concatenate(glimpses, axis=-1)        # (B, OUT*IN), matches torch.cat order

    # --- linear_merge: lane-dense (B, 64) x (64, 1024) bf16 MXU matmul, f32 accumulate ---
    o_ref[...] = jnp.dot(flat.astype(jnp.bfloat16), wm_ref[...],
                         preferred_element_type=jnp.float32) + bm


def prepare_attflat_params(w1, b1, w2, b2, wm, bm):
    """One-time (weight-load time) prep of kernel-ready parameters.

    Keeps the per-call path free of wrapper-side XLA ops (wm.T, reshapes, casts)."""
    assert w1.shape == (IN, MID) and b1.shape == (MID,)
    assert w2.shape == (MID, OUT) and b2.shape == (OUT,)
    assert wm.shape == (MERGE, IN * OUT) and bm.shape == (MERGE,)

    # torch layout is (MERGE, IN*OUT); x_atted @ wm.T => present (OUT*IN, MERGE).
    # Row index o*IN + i matches the glimpse-major concat above. Cast to bf16 once.
    wm_flat_bf16 = wm.T.astype(jnp.bfloat16)                       # (OUT*IN, MERGE)

    # Pack the three bias vectors into a single (2, MERGE) f32 array:
    #   row 0: bm ; row 1: [b1 | b2 | zeros]
    bias_pack = jnp.zeros((2, MERGE), dtype=jnp.float32)
    bias_pack = bias_pack.at[0, :].set(bm.astype(jnp.float32))
    bias_pack = bias_pack.at[1, :MID].set(b1.astype(jnp.float32))
    bias_pack = bias_pack.at[1, MID:MID + OUT].set(b2.astype(jnp.float32))

    return {
        "w1": w1.astype(jnp.float32),
        "w2": w2.astype(jnp.float32),
        "wm": wm_flat_bf16,
        "bias": bias_pack,
    }


@jax.jit
def attflat(x, x_mask_f, params):
    """x: (B,S,IN) f32; x_mask_f: (B,S,1) f32 (1.0 = padding). Returns (B, MERGE) f32."""
    assert x.shape == (B, S, IN), f"expected {(B, S, IN)}, got {x.shape}"
    assert x_mask_f.shape == (B, S, 1), f"expected {(B, S, 1)}, got {x_mask_f.shape}"
    assert params["w1"].shape == (IN, MID)
    assert params["w2"].shape == (MID, OUT)
    assert params["wm"].shape == (OUT * IN, MERGE)
    assert params["bias"].shape == (2, MERGE)

    # No grid: the whole problem (~160 KiB of operands) lives in VMEM for a single
    # program invocation; any grid would only add per-step overhead at this size.
    return pl.pallas_call(
        attflat_kernel,
        out_shape=jax.ShapeDtypeStruct((B, MERGE), jnp.float32),
        cost_estimate=pl.CostEstimate(
            flops=300_000, transcendentals=40, bytes_accessed=150_000),
    )(x, x_mask_f.astype(jnp.float32),
      params["w1"], params["w2"], params["wm"], params["bias"])


def attflat_ref(x, mask_bool, w1, b1, w2, b2, wm, bm):
    """Pure-JAX f32 reference mirroring the PyTorch forward (masked_fill semantics)."""
    att = jnp.maximum(x @ w1 + b1, 0.0) @ w2 + b2                    # (B, S, OUT)
    att = jnp.where(mask_bool[..., None], -1e9, att)
    att = jax.nn.softmax(att, axis=1)
    att_t_x = jnp.einsum('bso,bsi->boi', att, x)                     # (B, OUT, IN)
    x_atted = att_t_x.reshape(B, OUT * IN)                           # glimpse-major concat
    return x_atted @ wm.T + bm


if __name__ == "__main__":
    key = jax.random.PRNGKey(0)
    kx, k1, k2, k3, k4, k5, k6 = jax.random.split(key, 7)

    x = jax.random.normal(kx, (B, S, IN), dtype=jnp.float32)
    # boolean pad mask (True = padding): mask out the last 2 positions of sample 1
    mask_bool = jnp.zeros((B, S), dtype=bool).at[1, S - 2:].set(True)
    x_mask_f = mask_bool.astype(jnp.float32).reshape(B, S, 1)

    # deterministic synthetic parameters (shapes from module __init__)
    w1 = 0.1 * jax.random.normal(k1, (IN, MID), dtype=jnp.float32)          # FCNet linear
    b1 = 0.1 * jax.random.normal(k2, (MID,), dtype=jnp.float32)
    w2 = 0.1 * jax.random.normal(k3, (MID, OUT), dtype=jnp.float32)         # MLP.linear
    b2 = 0.1 * jax.random.normal(k4, (OUT,), dtype=jnp.float32)
    wm = 0.1 * jax.random.normal(k5, (MERGE, IN * OUT), dtype=jnp.float32)  # linear_merge (torch layout)
    bm = 0.1 * jax.random.normal(k6, (MERGE,), dtype=jnp.float32)

    # one-time weight prep (hoisted out of the per-call path)
    params = prepare_attflat_params(w1, b1, w2, b2, wm, bm)

    out = attflat(x, x_mask_f, params)
    out = jax.block_until_ready(out)

    ref = attflat_ref(x, mask_bool, w1, b1, w2, b2, wm, bm)
    assert out.shape == (B, MERGE)
    # tolerance loosened vs f32 reference: merge weight / activations are bf16 on the MXU
    assert jnp.allclose(out, ref, atol=5e-2, rtol=5e-2), "mismatch vs reference"

    # TODO(synk): dropout inside FCNet / MLP is identity at inference and is not modeled.
    print("KERNEL_OK")
</pallas_src>

<mosaic_0001>
module attributes {stable_mosaic.version = 11 : i64} {
  func.func @attflat_kernel(%arg0: memref<2x8x32xf32, #tpu.memory_space<vmem>>, %arg1: memref<2x8x1xf32, #tpu.memory_space<vmem>>, %arg2: memref<32x32xf32, #tpu.memory_space<vmem>>, %arg3: memref<32x2xf32, #tpu.memory_space<vmem>>, %arg4: memref<64x1024xbf16, #tpu.memory_space<vmem>>, %arg5: memref<2x1024xf32, #tpu.memory_space<vmem>>, %arg6: memref<2x1024xf32, #tpu.memory_space<vmem>>) attributes {dimension_semantics = [], scalar_prefetch = 0 : i64, scratch_operands = 0 : i64, tpu.core_type = #tpu.core_type<tc>} {
    %c0 = arith.constant 0 : index
    %c0_0 = arith.constant 0 : index
    %c0_1 = arith.constant 0 : index
    %0 = vector.load %arg0[%c0, %c0_0, %c0_1] : memref<2x8x32xf32, #tpu.memory_space<vmem>>, vector<2x8x32xf32>
    %c0_2 = arith.constant 0 : index
    %c0_3 = arith.constant 0 : index
    %1 = vector.load %arg5[%c0_2, %c0_3] : memref<2x1024xf32, #tpu.memory_space<vmem>>, vector<1x1024xf32>
    %c1 = arith.constant 1 : index
    %c0_4 = arith.constant 0 : index
    %2 = vector.load %arg5[%c1, %c0_4] : memref<2x1024xf32, #tpu.memory_space<vmem>>, vector<1x32xf32>
    %c1_5 = arith.constant 1 : index
    %c32 = arith.constant 32 : index
    %3 = vector.load %arg5[%c1_5, %c32] : memref<2x1024xf32, #tpu.memory_space<vmem>>, vector<1x2xf32>
    %4 = vector.shape_cast %0 : vector<2x8x32xf32> to vector<16x32xf32>
    %c0_6 = arith.constant 0 : index
    %c0_7 = arith.constant 0 : index
    %5 = vector.load %arg2[%c0_6, %c0_7] : memref<32x32xf32, #tpu.memory_space<vmem>>, vector<32x32xf32>
    %cst = arith.constant dense<0.000000e+00> : vector<16x32xf32>
    %6 = tpu.matmul %4, %5, %cst {dimension_numbers = #tpu.dot_dimension_numbers<[1], [0], [0], [1], [0, 0, 1, 1], [], []>} : vector<16x32xf32>, vector<32x32xf32>, vector<16x32xf32> -> vector<16x32xf32>
    %7 = vector.broadcast %2 : vector<1x32xf32> to vector<16x32xf32>
    %8 = arith.addf %6, %7 : vector<16x32xf32>
    %cst_8 = arith.constant 0.000000e+00 : f32
    %9 = vector.broadcast %cst_8 : f32 to vector<16x32xf32>
    %10 = arith.maximumf %8, %9 : vector<16x32xf32>
    %c0_9 = arith.constant 0 : index
    %c0_10 = arith.constant 0 : index
    %11 = vector.load %arg3[%c0_9, %c0_10] : memref<32x2xf32, #tpu.memory_space<vmem>>, vector<32x2xf32>
    %cst_11 = arith.constant dense<0.000000e+00> : vector<16x2xf32>
    %12 = tpu.matmul %10, %11, %cst_11 {dimension_numbers = #tpu.dot_dimension_numbers<[1], [0], [0], [1], [0, 0, 1, 1], [], []>} : vector<16x32xf32>, vector<32x2xf32>, vector<16x2xf32> -> vector<16x2xf32>
    %13 = vector.broadcast %3 : vector<1x2xf32> to vector<16x2xf32>
    %14 = arith.addf %12, %13 : vector<16x2xf32>
    %15 = vector.shape_cast %14 : vector<16x2xf32> to vector<2x8x2xf32>
    %c0_12 = arith.constant 0 : index
    %c0_13 = arith.constant 0 : index
    %c0_14 = arith.constant 0 : index
    %16 = vector.load %arg1[%c0_12, %c0_13, %c0_14] : memref<2x8x1xf32, #tpu.memory_space<vmem>>, vector<2x8x1xf32>
    %cst_15 = arith.constant -1.000000e+09 : f32
    %17 = vector.broadcast %cst_15 : f32 to vector<2x8x1xf32>
    %18 = arith.mulf %16, %17 : vector<2x8x1xf32>
    %19 = vector.broadcast %18 : vector<2x8x1xf32> to vector<2x8x2xf32>
    %20 = arith.addf %15, %19 : vector<2x8x2xf32>
    %cst_16 = arith.constant dense<0xFF800000> : vector<2x2xf32>
    %21 = vector.multi_reduction <maximumf>, %20, %cst_16 [1] : vector<2x8x2xf32> to vector<2x2xf32>
    %22 = vector.shape_cast %21 : vector<2x2xf32> to vector<2x1x2xf32>
    %23 = vector.broadcast %22 : vector<2x1x2xf32> to vector<2x8x2xf32>
    %24 = arith.subf %20, %23 : vector<2x8x2xf32>
    %25 = math.exp %24 : vector<2x8x2xf32>
    %cst_17 = arith.constant dense<0.000000e+00> : vector<2x2xf32>
    %26 = vector.multi_reduction <add>, %25, %cst_17 [1] : vector<2x8x2xf32> to vector<2x2xf32>
    %27 = vector.shape_cast %26 : vector<2x2xf32> to vector<2x1x2xf32>
    %28 = tpu.reciprocal %27 {approx = true} : vector<2x1x2xf32> -> vector<2x1x2xf32>
    %29 = vector.broadcast %28 : vector<2x1x2xf32> to vector<2x8x2xf32>
    %30 = arith.mulf %25, %29 : vector<2x8x2xf32>
    %31 = vector.extract_strided_slice %30 {offsets = [0, 0, 0], sizes = [2, 8, 1], strides = [1, 1, 1]} : vector<2x8x2xf32> to vector<2x8x1xf32>
    %32 = vector.broadcast %31 : vector<2x8x1xf32> to vector<2x8x32xf32>
    %33 = arith.mulf %32, %0 : vector<2x8x32xf32>
    %cst_18 = arith.constant dense<0.000000e+00> : vector<2x32xf32>
    %34 = vector.multi_reduction <add>, %33, %cst_18 [1] : vector<2x8x32xf32> to vector<2x32xf32>
    %35 = vector.extract_strided_slice %30 {offsets = [0, 0, 1], sizes = [2, 8, 1], strides = [1, 1, 1]} : vector<2x8x2xf32> to vector<2x8x1xf32>
    %36 = vector.broadcast %35 : vector<2x8x1xf32> to vector<2x8x32xf32>
    %37 = arith.mulf %36, %0 : vector<2x8x32xf32>
    %cst_19 = arith.constant dense<0.000000e+00> : vector<2x32xf32>
    %38 = vector.multi_reduction <add>, %37, %cst_19 [1] : vector<2x8x32xf32> to vector<2x32xf32>
    %39 = tpu.concatenate %34, %38 in 1 : vector<2x32xf32>, vector<2x32xf32> -> vector<2x64xf32>
    %40 = arith.truncf %39 : vector<2x64xf32> to vector<2x64xbf16>
    %c0_20 = arith.constant 0 : index
    %c0_21 = arith.constant 0 : index
    %41 = vector.load %arg4[%c0_20, %c0_21] : memref<64x1024xbf16, #tpu.memory_space<vmem>>, vector<64x1024xbf16>
    %cst_22 = arith.constant dense<0.000000e+00> : vector<2x1024xf32>
    %42 = tpu.matmul %40, %41, %cst_22 {dimension_numbers = #tpu.dot_dimension_numbers<[1], [0], [0], [1], [0, 0, 1, 1], [], []>} : vector<2x64xbf16>, vector<64x1024xbf16>, vector<2x1024xf32> -> vector<2x1024xf32>
    %43 = vector.broadcast %1 : vector<1x1024xf32> to vector<2x1024xf32>
    %44 = arith.addf %42, %43 : vector<2x1024xf32>
    %c0_23 = arith.constant 0 : index
    %c0_24 = arith.constant 0 : index
    %45 = vector.load %arg6[%c0_23, %c0_24] : memref<2x1024xf32, #tpu.memory_space<vmem>>, vector<2x1024xf32>
    tpu.vector_store %arg6[%c0_23, %c0_24], %44 {strides = array<i32>} : memref<2x1024xf32, #tpu.memory_space<vmem>>, vector<2x1024xf32>,
    return
  }
}

</mosaic_0001>

<bundles_post_ra>
// kernel: attflat.1
= control target key start
LH: loop header
LB: loop body
LE: loop exit
PB: predicated region body
PF: predicated region fallthrough
CT: control target
= control target key end

     0   :  { %11 = vsyncpa [#allocation3], 0  ;;  %s1105_s0 = inlined_call_operand.vmem [shape: f32[2,8,32], index: 0, kind: input, shape index: {}]   ;;  %s1106_s1 = inlined_call_operand.vmem [shape: f32[2,8,1], index: 1, kind: input, shape index: {}]   ;;  %s1107_s2 = inlined_call_operand.vmem [shape: f32[32,32], index: 2, kind: input, shape index: {}]   ;;  %s1108_s3 = inlined_call_operand.vmem [shape: f32[32,2], index: 3, kind: input, shape index: {}]   ;;  %s1109_s4 = inlined_call_operand.hbm [shape: bf16[64,1024], index: 4, kind: input, shape index: {}]   ;;  %s1110_s5 = inlined_call_operand.hbm [shape: f32[2,1024], index: 5, kind: input, shape index: {}]   ;;  %s1111_s6 = inlined_call_operand.hbm [shape: f32[2,1024], index: 6, kind: output, shape index: {}]  }
   0x1   :  { %12 = vsyncpa [#allocation6], 0 }
   0x2   :  { %13 = vsyncpa [#allocation4], 0  ;;  %s979_s21 = smov [#allocation2]  }
   0x3   :  { %s27_s22 = sshll.u32 %s979_s21, 4  ;;  %s28_s22 = int_to_ptr.vmem [resolvable:$true] %s27_s22 }
   0x4   :  { %s921_s23 = scalar_lea.vmem %s28_s22, 4096  ;;  %p926_p1 = scmp.lt.s32.totalorder %s28_s22, %s28_s22 }
   0x5   :  { %p922_p0 = scmp.ne.s32.totalorder %s28_s22, %s921_s23  ;;  %p927_p2 = scmp.lt.s32.totalorder %s921_s23, %s921_s23 }
   0x7   :  { %p928_p3 = por %p927_p2, %p926_p1 }
   0x9   :  { %p929_p4 = pnand %p928_p3, %p922_p0 }
   0xb   :  { %932 = shalt.err (!%p929_p4)
}
   0xc   :  { %s980_s24 = smov 512   ;;  %s981_s25 = smov 32  }
   0xd   :  { %33 = dma.hbm_to_vmem [thread:$0]  %s1109_s4, 4096, %s28_s22, [#allocation3], %s980_s24, %s980_s24, %s981_s25  }
   0xe   :  { %s982_s28 = smov [#allocation5]  }
   0xf   :  { %s40_s29 = sshll.u32 %s982_s28, 4  ;;  %s41_s29 = int_to_ptr.vmem [resolvable:$true] %s40_s29 }
  0x10   :  { %s941_s30 = scalar_lea.vmem %s41_s29, 256  ;;  %p946_p6 = scmp.lt.s32.totalorder %s41_s29, %s41_s29 }
  0x11   :  { %p942_p5 = scmp.ne.s32.totalorder %s41_s29, %s941_s30  ;;  %p947_p7 = scmp.lt.s32.totalorder %s941_s30, %s941_s30 }
  0x13   :  { %p948_p8 = por %p947_p7, %p946_p6 }
  0x15   :  { %p949_p9 = pnand %p948_p8, %p942_p5 }
  0x17   :  { %952 = shalt.err (!%p949_p9)
}
  0x18   :  { %43 = dma.hbm_to_vmem [thread:$0]  %s1110_s5, 256, %s41_s29, [#allocation6]  }
  0x19   :  { %973 = dma.done.wait [#allocation3], 4096  }
  0x1a   :  { %974 = vsyncadd [#allocation3], 4294963200 }
  0x1b   :  { %975 = dma.done.wait [#allocation6], 256  }
  0x1c   :  { %976 = vsyncadd [#allocation6], 4294967040  ;;  %vm63_vm0 = vcmask 261120   ;;  %v58_v0 = vld [vmem:[%s1107_s2 + $0x18] sm:$0xff]  ;;  %v57_v1 = vld [vmem:[%s1107_s2 + $0x10] sm:$0xff]  ;;  %v983_v13 = vmov 0  }
  0x1d   :  { %870 = vmatprep.subr.mxu0 %v58_v0  ;;  %v1039_v2 = vld [vmem:[%s1105_s0] sm:$0xff]  ;;  %v56_v3 = vld [vmem:[%s1107_s2 + $0x8] sm:$0xff]  ;;  %v150_v6 = vld [vmem:[%s1108_s3 + $0x18] sm:$0xff]  ;;  %901 = vset.pattern.permute.xlu0 %v983_v13  ;;  %s984_s30 = smov 96   ;;  %v985_v22 = vmov 1   ;;  %vm252_vm1 = vcmask 15360  }
  0x1e   :  { %871 = vmatpush3.msra.mxu0 %v58_v0  ;;  %878 = vmatprep.mubr.msk.f32.mxu0 %vm63_vm0, %v1039_v2  ;;  %v55_v4 = vld [vmem:[%s1107_s2] sm:$0xff]  ;;  %v1052_v5 = vld [vmem:[%s1105_s0 + $0x8] sm:$0xff]  ;;  %v149_v7 = vld [vmem:[%s1108_s3 + $0x10] sm:$0xff]  ;;  %vm343_vm2 = vcmask 1041409   ;;  %vm587_vm3 = vcmask 523264  }
  0x1f   :  { %872 = vmatprep.subr.mxu0 %v57_v1  ;;  %881 = vmatprep.subr.mxu1 %v150_v6  ;;  %v148_v8 = vld [vmem:[%s1108_s3 + $0x8] sm:$0xff]  ;;  %v147_v9 = vld [vmem:[%s1108_s3] sm:$0xff] }
  0x20   :  { %873 = vmatpush3.msra.mxu0 %v57_v1  ;;  %882 = vmatpush3.msra.mxu1 %v150_v6  ;;  %v817_v10 = vld [vmem:[#allocation5 + $0x1] ss:$0 sm:$0xff]  ;;  %v237_v12 = vld [vmem:[%s1106_s1 + $0x8] sm:$0xff] }
  0x21   :  { %874 = vmatprep.subr.mxu0 %v56_v3  ;;  %883 = vmatprep.subr.mxu1 %v149_v7  ;;  %v236_v11 = vld [vmem:[%s1106_s1] sm:$0xff]  ;;  %v239_v15 = vmul.f32 -1e+09, %v237_v12  ;;  %s987_s1 = smov [#allocation7]  }
  0x22   :  { %875 = vmatpush3.msra.mxu0 %v56_v3  ;;  %884 = vmatpush3.msra.mxu1 %v149_v7  ;;  %v238_v14 = vmul.f32 -1e+09, %v236_v11  ;;  %s807_s3 = sshll.u32 %s987_s1, 4  ;;  %s808_s3 = int_to_ptr.vmem [resolvable:$true] %s807_s3 }
  0x23   :  { %876 = vmatprep.subr.mxu0 %v55_v4  ;;  %885 = vmatprep.subr.mxu1 %v148_v8  ;;  %p958_p11 = scmp.lt.s32.totalorder %s808_s3, %s808_s3 }
  0x24   :  { %877 = vmatpush3.msra.mxu0 %v55_v4  ;;  %886 = vmatpush3.msra.mxu1 %v148_v8  ;;  %v378_v8 = vld [vmem:[#allocation2 + $0xc0] sm:$0xff] }
  0x25   :  { %879 = vmatmul.mubr.msk.f32.vlgmr.msra.gmra.mxu0 %vm63_vm0, %v1052_v5  ;;  %887 = vmatprep.subr.mxu1 %v147_v9 }
  0x26   :  { %888 = vmatpush3.msra.mxu1 %v147_v9  ;;  %152 = vrot.lane.b32.xlu1 %v817_v10, %s984_s30  ;;  %v382_v9 = vld [vmem:[#allocation2 + $0xe0] sm:$0xff] }
  0x27   :  { %623 = vmatprep.mubr.bf16.mxu0 %v983_v13  ;;  %242 = vperm.xlu0 %901, %v238_v14   ;;  %v846_v11 = vcombine.low %v378_v8, %v382_v9  ;;  %v847_v12 = vcombine.high %v378_v8, %v382_v9  ;;  %v383_v14 = vld [vmem:[#allocation2 + $0xe8] sm:$0xff] }
  0x28   :  { %902 = vset.pattern.permute.xlu1 %v985_v22 }
  0x29   :  { %599 = vmatprep.subr.bf16.mxu0 %v847_v12 }
  0x2a   :  { %600 = vmatpush1.bf16.msra.mxu0 %v846_v11 }
  0x2b   :  { %247 = vperm.xlu0 %901, %v239_v15   ;;  %v370_v15 = vld [vmem:[#allocation2 + $0x80] sm:$0xff] }
  0x2f   :  { %903 = vset.pattern.permute.xlu0 %v985_v22  ;;  %v362_v22 = vld [vmem:[#allocation2 + $0x40] sm:$0xff] }
  0x98   :  { %v153_v24 = vpop.permute.xlu1 %152 }
  0xa2   :  { %v243_v23 = vpop.permute.xlu0 %242 }
  0xa6   :  { %v248_v27 = vpop.permute.xlu0 %247 }
  0xe5   :  { %v880_v16 = vpop.f32.mrf.mxu0 }
  0xe6   :  { %v142_v17 = vadd.f32 %v880_v16, %v817_v10  ;;  %v374_v16 = vld [vmem:[#allocation2 + $0xa0] sm:$0xff] }
  0xe7   :  { %v136_v18 = vpop.f32.mrf.mxu0 }
  0xe8   :  { %v137_v19 = vadd.f32 %v817_v10, %v136_v18  ;;  %v146_v21 = vmax.f32 %v142_v17, 0.0  ;;  %v379_v10 = vld [vmem:[#allocation2 + $0xc8] sm:$0xff] }
  0xe9   :  { %v848_v17 = vcombine.low %v379_v10, %v383_v14  ;;  %v849_v18 = vcombine.high %v379_v10, %v383_v14 }
  0xea   :  { %v145_v20 = vmax.f32 %v137_v19, 0.0  ;;  %v839_v19 = vcombine.high %v370_v15, %v374_v16 }
  0xeb   :  { %640 = vmatprep.subr.bf16.mxu1 %v849_v18 }
  0xec   :  { %889 = vmatprep.mubr.msk.f32.mxu1 %vm63_vm0, %v145_v20  ;;  %v371_v20 = vld [vmem:[#allocation2 + $0x88] sm:$0xff]  ;;  %601 = vmatprep.subr.bf16.mxu0 %v839_v19 }
  0xed   :  { %890 = vmatmul.mubr.msk.f32.vlgmr.msra.gmra.mxu1 %vm63_vm0, %v146_v21  ;;  %v375_v21 = vld [vmem:[#allocation2 + $0xa8] sm:$0xff] }
  0xee   :  { %664 = vmatprep.mubr.bf16.mxu1 %v983_v13  ;;  %641 = vmatpush1.bf16.msra.mxu1 %v848_v17 }
 0x1ad   :  { %v891_v25 = vpop.f32.mrf.mxu1 }
 0x1ae   :  { %v233_v26 = vadd.f32 %v891_v25, %v153_v24  ;;  %v363_v25 = vld [vmem:[#allocation2 + $0x48] sm:$0xff] }
 0x1af   :  { %v227_v28 = vpop.f32.mrf.mxu1 }
 0x1b0   :  { %v251_v29 = vadd.f32 %v248_v27, %v233_v26  ;;  %v228_v30 = vadd.f32 %v227_v28, %v153_v24  ;;  %v366_v24 = vld [vmem:[#allocation2 + $0x60] sm:$0xff]  ;;  %v367_v26 = vld [vmem:[#allocation2 + $0x68] sm:$0xff]  ;;  %v838_v27 = vcombine.low %v370_v15, %v374_v16  ;;  %v840_v28 = vcombine.low %v371_v20, %v375_v21 }
 0x1b2   :  { %v260_v31 = vsel %vm252_vm1, %v251_v29, -inf  ;;  %v250_v32 = vadd.f32 %v243_v23, %v228_v30  ;;  %v841_v23 = vcombine.high %v371_v20, %v375_v21  ;;  %v833_v30 = vcombine.high %v363_v25, %v367_v26  ;;  %602 = vmatpush1.bf16.msra.mxu0 %v838_v27 }
 0x1b3   :  { %v261_v33 = vrot.slane %v260_v31, 4 }
 0x1b4   :  { %v253_v34 = vsel %vm252_vm1, %v250_v32, -inf  ;;  %642 = vmatprep.subr.bf16.mxu1 %v841_v23 }
 0x1b5   :  { %v262_v35 = vmax.f32 %v260_v31, %v261_v33  ;;  %v254_v36 = vrot.slane %v253_v34, 4  ;;  %v354_v31 = vld [vmem:[#allocation2] sm:$0xff]  ;;  %v355_v33 = vld [vmem:[#allocation2 + $0x8] sm:$0xff]  ;;  %643 = vmatpush1.bf16.msra.mxu1 %v840_v28 }
 0x1b6   :  { %644 = vmatprep.subr.bf16.mxu1 %v833_v30 }
 0x1b7   :  { %v263_v37 = vrot.slane %v262_v35, 2  ;;  %v255_v38 = vmax.f32 %v253_v34, %v254_v36  ;;  %v359_v34 = vld [vmem:[#allocation2 + $0x28] sm:$0xff]  ;;  %v832_v36 = vcombine.low %v363_v25, %v367_v26  ;;  %v372_v25 = vld [vmem:[#allocation2 + $0x90] sm:$0xff]  ;;  %v373_v26 = vld [vmem:[#allocation2 + $0x98] sm:$0xff] }
 0x1b9   :  { %v264_v39 = vmax.f32 %v262_v35, %v263_v37  ;;  %v256_v40 = vrot.slane %v255_v38, 2  ;;  %v830_v35 = vcombine.low %v362_v22, %v366_v24  ;;  %645 = vmatpush1.bf16.msra.mxu1 %v832_v36  ;;  %v369_v36 = vld [vmem:[#allocation2 + $0x78] sm:$0xff] }
 0x1bb   :  { %v265_v41 = vrot.slane %v264_v39, 1  ;;  %v257_v42 = vmax.f32 %v255_v38, %v256_v40  ;;  %v825_v38 = vcombine.high %v355_v33, %v359_v34  ;;  %v824_v40 = vcombine.low %v355_v33, %v359_v34  ;;  %v364_v33 = vld [vmem:[#allocation2 + $0x50] sm:$0xff] }
 0x1bc   :  { %v368_v34 = vld [vmem:[#allocation2 + $0x70] sm:$0xff] }
 0x1bd   :  { %v266_v43 = vmax.f32 %v264_v39, %v265_v41  ;;  %v258_v44 = vrot.slane %v257_v42, 1  ;;  %646 = vmatprep.subr.bf16.mxu1 %v825_v38 }
 0x1be   :  { %647 = vmatpush1.bf16.msra.mxu1 %v824_v40 }
 0x1bf   :  { %v268_v45 = vsub.f32 %v251_v29, %v266_v43  ;;  %v259_v46 = vmax.f32 %v257_v42, %v258_v44  ;;  %v831_v29 = vcombine.high %v362_v22, %v366_v24 }
 0x1c1   :  { %v271_v47 = vmul.f32 1.442695, %v268_v45  ;;  %v267_v48 = vsub.f32 %v250_v32, %v259_v46  ;;  %v358_v32 = vld [vmem:[#allocation2 + $0x20] sm:$0xff]  ;;  %603 = vmatprep.subr.bf16.mxu0 %v831_v29 }
 0x1c2   :  { %v823_v37 = vcombine.high %v354_v31, %v358_v32  ;;  %604 = vmatpush1.bf16.msra.mxu0 %v830_v35  ;;  %v822_v39 = vcombine.low %v354_v31, %v358_v32  ;;  %v365_v35 = vld [vmem:[#allocation2 + $0x58] sm:$0xff] }
 0x1c3   :  { %905 = vpow2.f32 %v271_v47  ;;  %v269_v49 = vmul.f32 1.442695, %v267_v48  ;;  %v380_v48 = vld [vmem:[#allocation2 + $0xd0] sm:$0xff]  ;;  %v837_v40 = vcombine.high %v365_v35, %v369_v36 }
 0x1c4   :  { %605 = vmatprep.subr.bf16.mxu0 %v823_v37 }
 0x1c5   :  { %907 = vpow2.f32 %v269_v49  ;;  %v384_v49 = vld [vmem:[#allocation2 + $0xf0] sm:$0xff] }
 0x1c6   :  { %606 = vmatpush1.bf16.msra.mxu0 %v822_v39  ;;  %v835_v39 = vcombine.high %v364_v33, %v368_v34 }
 0x1d0   :  { %v906_v50 = vpop.eup %905 }
 0x1d1   :  { %v280_v51 = vsel %vm252_vm1, %v906_v50, 0.0 }
 0x1d2   :  { %v908_v52 = vpop.eup %907  ;;  %v281_v53 = vrot.slane %v280_v51, 4 }
 0x1d3   :  { %v273_v54 = vsel %vm252_vm1, %v908_v52, 0.0 }
 0x1d4   :  { %v282_v55 = vadd.f32 %v281_v53, %v280_v51  ;;  %v274_v56 = vrot.slane %v273_v54, 4  ;;  %v851_v53 = vcombine.high %v380_v48, %v384_v49 }
 0x1d6   :  { %v283_v57 = vrot.slane %v282_v55, 2  ;;  %v275_v58 = vadd.f32 %v274_v56, %v273_v54  ;;  %v385_v54 = vld [vmem:[#allocation2 + $0xf8] sm:$0xff]  ;;  %681 = vmatprep.subr.bf16.mxu0 %v851_v53 }
 0x1d8   :  { %v284_v59 = vadd.f32 %v283_v57, %v282_v55  ;;  %v276_v60 = vrot.slane %v275_v58, 2  ;;  %v850_v55 = vcombine.low %v380_v48, %v384_v49 }
 0x1da   :  { %v285_v61 = vrot.slane %v284_v59, 1  ;;  %v277_v62 = vadd.f32 %v276_v60, %v275_v58 }
 0x1dc   :  { %v286_v63 = vadd.f32 %v285_v61, %v284_v59  ;;  %v278_v0 = vrot.slane %v277_v62, 1 }
 0x1de   :  { %909 = vrcp.f32 %v286_v63  ;;  %v279_v1 = vadd.f32 %v278_v0, %v277_v62 }
 0x1e0   :  { %911 = vrcp.f32 %v279_v1 }
 0x1eb   :  { %v910_v3 = vpop.eup %909 }
 0x1ec   :  { %v290_v4 = vmul.f32 %v910_v3, %v906_v50  ;;  %v381_v50 = vld [vmem:[#allocation2 + $0xd8] sm:$0xff] }
 0x1ed   :  { %v912_v6 = vpop.eup %911  ;;  %v852_v56 = vcombine.low %v381_v50, %v385_v54  ;;  %v853_v57 = vcombine.high %v381_v50, %v385_v54 }
 0x1ee   :  { %322 = vperm.xlu0 %903, %v290_v4   ;;  %v289_v7 = vmul.f32 %v912_v6, %v908_v52 }
 0x1ef   :  { %722 = vmatprep.subr.bf16.mxu1 %v853_v57 }
 0x1f0   :  { %318 = vperm.xlu1 %902, %v289_v7  }
 0x1f4   :  { %904 = vset.pattern.permute.xlu1 %v983_v13 }
 0x1f5   :  { %293 = vperm.xlu1 %904, %v289_v7  }
 0x1f9   :  { %298 = vperm.xlu1 %904, %v290_v4  }
 0x269   :  { %v323_v41 = vpop.permute.xlu0 %322 }
 0x26a   :  { %v326_v42 = vmul.f32 %v323_v41, %v1052_v5  ;;  %v356_v41 = vld [vmem:[#allocation2 + $0x10] sm:$0xff] }
 0x26b   :  { %v319_v43 = vpop.permute.xlu1 %318 }
 0x26c   :  { %v334_v44 = vsel %vm63_vm0, %v326_v42, 0.0  ;;  %v325_v45 = vmul.f32 %v319_v43, %v1039_v2  ;;  %v360_v42 = vld [vmem:[#allocation2 + $0x30] sm:$0xff]  ;;  %v357_v43 = vld [vmem:[#allocation2 + $0x18] sm:$0xff] }
 0x26d   :  { %v335_v46 = vrot.slane %v334_v44, 4  ;;  %v826_v49 = vcombine.low %v356_v41, %v360_v42 }
 0x26e   :  { %v327_v47 = vsel %vm63_vm0, %v325_v45, 0.0  ;;  %v834_v45 = vcombine.low %v364_v33, %v368_v34 }
 0x26f   :  { %v336_v51 = vadd.f32 %v335_v46, %v334_v44  ;;  %v328_v52 = vrot.slane %v327_v47, 4  ;;  %v361_v44 = vld [vmem:[#allocation2 + $0x38] sm:$0xff]  ;;  %v836_v46 = vcombine.low %v365_v35, %v369_v36 }
 0x270   :  { %v294_v6 = vpop.permute.xlu1 %293  ;;  %v829_v48 = vcombine.high %v357_v43, %v361_v44  ;;  %v828_v50 = vcombine.low %v357_v43, %v361_v44 }
 0x271   :  { %v337_v58 = vrot.slane %v336_v51, 2  ;;  %v329_v59 = vadd.f32 %v328_v52, %v327_v47  ;;  %v301_v9 = vmul.f32 %v294_v6, %v1039_v2  ;;  %v377_v2 = vld [vmem:[#allocation2 + $0xb8] sm:$0xff]  ;;  %v827_v47 = vcombine.high %v356_v41, %v360_v42 }
 0x272   :  { %v845_v32 = vcombine.high %v373_v26, %v377_v2  ;;  %v844_v38 = vcombine.low %v373_v26, %v377_v2  ;;  %v986_v52 = vmov 1983009808  }
 0x273   :  { %v338_v60 = vadd.f32 %v337_v58, %v336_v51  ;;  %v330_v61 = vrot.slane %v329_v59, 2  ;;  %v303_v11 = vsel %vm63_vm0, %v301_v9, 0.0  ;;  %v766_v53 = vunpack.c.l.s4 %v986_v52  ;;  %v53_v58 = vld [vmem:[#allocation5] ss:$2 sm:$0xff] }
 0x274   :  { %v299_v7 = vpop.permute.xlu1 %298  ;;  %v304_v14 = vrot.slane %v303_v11, 4 }
 0x275   :  { %v331_v62 = vadd.f32 %v330_v61, %v329_v59  ;;  %v339_v63 = vrot.slane %v338_v60, 1  ;;  %v302_v8 = vmul.f32 %v299_v7, %v1052_v5  ;;  %v376_v5 = vld [vmem:[#allocation2 + $0xb0] sm:$0xff]  ;;  %v767_v59 = vunpack.c.0.s8 %v766_v53 }
 0x276   :  { %v305_v16 = vadd.f32 %v304_v14, %v303_v11  ;;  %v843_v31 = vcombine.high %v372_v25, %v376_v5  ;;  %v842_v37 = vcombine.low %v372_v25, %v376_v5 }
 0x277   :  { %v332_v0 = vrot.slane %v331_v62, 1  ;;  %v340_v3 = vadd.f32 %v339_v63, %v338_v60  ;;  %v310_v10 = vsel %vm63_vm0, %v302_v8, 0.0 }
 0x278   :  { %v311_v12 = vrot.slane %v310_v10, 4  ;;  %v306_v18 = vrot.slane %v305_v16, 2 }
 0x279   :  { %v333_v1 = vadd.f32 %v332_v0, %v331_v62 }
 0x27a   :  { %v312_v15 = vadd.f32 %v311_v12, %v310_v10  ;;  %v307_v20 = vadd.f32 %v306_v18, %v305_v16 }
 0x27b   :  { %v348_v4 = vsel %vm343_vm2, %v340_v3, %v333_v1 }
 0x27c   :  { %349 = vrot.lane.b32.xlu0 %v348_v4, %s981_s25  ;;  %v313_v17 = vrot.slane %v312_v15, 2  ;;  %v308_v22 = vrot.slane %v307_v20, 1  ;;  %s953_s25 = scalar_lea.vmem %s808_s3, 256 }
 0x27d   :  { %p954_p10 = scmp.ne.s32.totalorder %s808_s3, %s953_s25  ;;  %p959_p12 = scmp.lt.s32.totalorder %s953_s25, %s953_s25 }
 0x27e   :  { %v314_v19 = vadd.f32 %v313_v17, %v312_v15  ;;  %v309_v24 = vadd.f32 %v308_v22, %v307_v20 }
 0x27f   :  { %p960_p13 = por %p959_p12, %p958_p11 }
 0x280   :  { %v315_v21 = vrot.slane %v314_v19, 1 }
 0x281   :  { %p961_p0 = pnand %p960_p13, %p954_p10 }
 0x282   :  { %v316_v23 = vadd.f32 %v315_v21, %v314_v19 }
 0x284   :  { %v344_v28 = vsel %vm343_vm2, %v316_v23, %v309_v24 }
 0x2ee   :  { %v350_v27 = vpop.permute.xlu0 %349 }
 0x2ef   :  { %v352_v29 = vsel %vm63_vm0, %v344_v28, %v350_v27 }
 0x2f0   :  { %v353_v30 = vpack.c.bf16 %v352_v29, %v352_v29 }
 0x2f2   :  { %854 = vmatmul.mubr.msk.bf16.vlgmr.msra.gmra.mxu0 %vm587_vm3, %v353_v30  ;;  %855 = vmatmul.mubr.msk.bf16.vlgmr.msra.gmra.mxu1 %vm587_vm3, %v353_v30 }
 0x2f3   :  { %682 = vmatpush1.bf16.msra.mxu0 %v850_v55  ;;  %723 = vmatpush1.bf16.msra.mxu1 %v852_v56 }
 0x2f4   :  { %683 = vmatprep.subr.bf16.mxu0 %v843_v31  ;;  %724 = vmatprep.subr.bf16.mxu1 %v845_v32 }
 0x2f5   :  { %705 = vmatprep.mubr.bf16.mxu0 %v983_v13  ;;  %746 = vmatprep.mubr.bf16.mxu1 %v983_v13  ;;  %v387_v13 = vlaneseq }
 0x2f7   :  { %684 = vmatpush1.bf16.msra.mxu0 %v842_v37  ;;  %725 = vmatpush1.bf16.msra.mxu1 %v844_v38  ;;  %v388_v51 = vshrl.u32 %v387_v13, 7 }
 0x2f8   :  { %685 = vmatprep.subr.bf16.mxu0 %v835_v39  ;;  %726 = vmatprep.subr.bf16.mxu1 %v837_v40 }
 0x2f9   :  { %v389_v54 = vsub.s32 0, %v388_v51  ;;  %v397_v55 = vsub.s32 2, %v388_v51  ;;  %v393_v56 = vsub.s32 1, %v388_v51  ;;  %v401_v57 = vsub.s32 3, %v388_v51 }
 0x2fa   :  { %v770_v4 = vsub.s32 %v767_v59, %v388_v51  ;;  %v405_v21 = vsub.s32 4, %v388_v51  ;;  %v413_v22 = vsub.s32 6, %v388_v51  ;;  %v409_v23 = vsub.s32 5, %v388_v51 }
 0x2fb   :  { %686 = vmatpush1.bf16.msra.mxu0 %v834_v45  ;;  %727 = vmatpush1.bf16.msra.mxu1 %v836_v46  ;;  %v390_v60 = vrot.slane %v53_v58, %v389_v54  ;;  %v398_v61 = vrot.slane %v53_v58, %v397_v55  ;;  %v394_v62 = vrot.slane %v53_v58, %v393_v56  ;;  %v417_v24 = vsub.s32 7, %v388_v51 }
 0x2fc   :  { %687 = vmatprep.subr.bf16.mxu0 %v827_v47  ;;  %728 = vmatprep.subr.bf16.mxu1 %v829_v48  ;;  %v402_v63 = vrot.slane %v53_v58, %v401_v57  ;;  %v406_v25 = vrot.slane %v53_v58, %v405_v21  ;;  %v414_v5 = vrot.slane %v53_v58, %v413_v22 }
 0x2fd   :  { %v410_v26 = vrot.slane %v53_v58, %v409_v23  ;;  %v418_v2 = vrot.slane %v53_v58, %v417_v24 }
 0x2ff   :  { %688 = vmatpush1.bf16.msra.mxu0 %v826_v49  ;;  %729 = vmatpush1.bf16.msra.mxu1 %v828_v50 }
 0x302   :  { %856 = vmatmul.mubr.msk.bf16.vlgmr.msra.gmra.mxu0 %vm587_vm3, %v353_v30  ;;  %857 = vmatmul.mubr.msk.bf16.vlgmr.msra.gmra.mxu1 %vm587_vm3, %v353_v30 }
 0x3b2   :  { %v625_v0 = vpop.f32.mrf.mxu0  ;;  %v666_v1 = vpop.f32.mrf.mxu1 }
 0x3b3   :  { %v626_v7 = vadd.f32 %v625_v0, %v390_v60  ;;  %v667_v8 = vadd.f32 %v666_v1, %v398_v61 }
 0x3b4   :  { %v627_v3 = vpop.f32.mrf.mxu0  ;;  %v668_v6 = vpop.f32.mrf.mxu1 }
 0x3b5   :  { %v628_v9 = vadd.f32 %v627_v3, %v394_v62  ;;  %v669_v10 = vadd.f32 %v668_v6, %v402_v63 }
 0x3b6   :  { %v629_v11 = vpop.f32.mrf.mxu0  ;;  %v670_v12 = vpop.f32.mrf.mxu1 }
 0x3b7   :  { %v763_v14 = vcombine.low %v626_v7, %v628_v9  ;;  %v764_v15 = vcombine.low %v667_v8, %v669_v10 }
 0x3b8   :  { %v630_v16 = vpop.f32.mrf.mxu0  ;;  %v671_v17 = vpop.f32.mrf.mxu1 }
 0x3b9   :  { %v771_v18 = vrot.slane %v763_v14, %v770_v4  ;;  %v778_v19 = vrot.slane %v764_v15, %v770_v4 }
 0x3bb   :  { %v779_v20 = vcombine.low %v771_v18, %v778_v19 }
 0x3bd   :  { %799 = vst [vmem:[#allocation7] sm:$0xff] %v779_v20 }
 0x3c2   :  { %v707_v27 = vpop.f32.mrf.mxu0  ;;  %v748_v28 = vpop.f32.mrf.mxu1 }
 0x3c3   :  { %v708_v31 = vadd.f32 %v707_v27, %v406_v25  ;;  %v749_v32 = vadd.f32 %v748_v28, %v414_v5 }
 0x3c4   :  { %v709_v29 = vpop.f32.mrf.mxu0  ;;  %v750_v30 = vpop.f32.mrf.mxu1 }
 0x3c5   :  { %v710_v33 = vadd.f32 %v709_v29, %v410_v26  ;;  %v751_v34 = vadd.f32 %v750_v30, %v418_v2 }
 0x3c6   :  { %v711_v35 = vpop.f32.mrf.mxu0  ;;  %v752_v36 = vpop.f32.mrf.mxu1 }
 0x3c7   :  { %v780_v37 = vcombine.low %v708_v31, %v710_v33  ;;  %v781_v38 = vcombine.low %v749_v32, %v751_v34 }
 0x3c8   :  { %v712_v39 = vpop.f32.mrf.mxu0  ;;  %v753_v40 = vpop.f32.mrf.mxu1 }
 0x3c9   :  { %v788_v41 = vrot.slane %v780_v37, %v770_v4  ;;  %v795_v42 = vrot.slane %v781_v38, %v770_v4 }
 0x3cb   :  { %v796_v43 = vcombine.low %v788_v41, %v795_v42 }
 0x3cd   :  { %800 = vst [vmem:[#allocation7 + $0x8] sm:$0xff] %v796_v43 }
 0x3ce   :  { %964 = shalt.err (!%p961_p0)
}
 0x3cf   :  { %810 = dma.vmem_to_hbm [thread:$0]  %s808_s3, 256, %s1111_s6, [#allocation4]  }
 0x3d0   :  { %977 = dma.done.wait [#allocation4], 256  }
 0x3d1   :  { %978 = vsyncadd [#allocation4], 4294967040 }
 0x3d2   :  { %814 = vsyncpa [#allocation3], 1 }
 0x3d3   :  { %815 = vsyncpa [#allocation6], 1 }
 0x3d4   :  { %816 = vsyncpa [#allocation4], 1 }

</bundles_post_ra>
